<compile_context>
chip_gen: v7x
topology: tpu7x:2x2x1
jax: 0.10.0
libtpu: 0.0.40
codegen_flags: <defaults>
</compile_context>

<pallas_src>
import jax
import jax.numpy as jnp
from jax.experimental import pallas as pl
from jax.experimental.pallas import tpu as pltpu


def _round_up(a, b):
    return ((a + b - 1) // b) * b


def _sublane_multiple(dtype):
    # sublane tile: 8 rows for 32-bit, 16 for 16-bit, 32 for 8-bit dtypes
    return 8 * max(1, 4 // jnp.dtype(dtype).itemsize)


def _deconv_bn_relu_kernel(x_ref, w_ref, shift_ref, o_ref):
    # x_ref:     (TB, C_in, T)  lane-dense tile of TB images' planes
    # w_ref:     (C_out, C_in)  resident weight with BN scale pre-folded
    # shift_ref: (C_out, 1)     folded conv-bias + BN shift
    x = x_ref[...]
    tb = x.shape[0]
    w = jnp.broadcast_to(w_ref[...][None], (tb,) + w_ref.shape)   # tiny
    # 1x1 transposed conv == per-image channel matmul; f32 accumulation.
    y = jax.lax.dot_general(
        w, x,
        dimension_numbers=(((2,), (1,)), ((0,), (0,))),
        preferred_element_type=jnp.float32)                       # (TB, C_out, T)
    y = y + shift_ref[...]          # scale already folded into w -> single add
    o_ref[...] = jnp.maximum(y, 0.0).astype(o_ref.dtype)


def deconv2d_block_forward(x_nchw, weight, conv_bias, bn_gamma, bn_beta,
                           bn_mean, bn_var, eps=1e-5):
    """Forward of DeConv2DBlock with kernel=(1,1), stride=(1,1), pad=(0,0), g=1."""
    n, c_in, h, w = x_nchw.shape
    c_out = weight.shape[1]          # ConvTranspose2d weight: (C_in, C_out, kH, kW)
    hw = h * w
    out_dtype = x_nchw.dtype
    in_item = jnp.dtype(x_nchw.dtype).itemsize
    out_item = jnp.dtype(out_dtype).itemsize

    # ---- wrapper glue: cheap reshapes only (no big transposes, no pads) ----
    x3 = x_nchw.reshape(n, c_in, hw)                     # NCHW -> (N, C_in, H*W)
    w_t = weight.reshape(c_in, c_out).T                  # (C_out, C_in), tiny
    inv_std = 1.0 / jnp.sqrt(bn_var.astype(jnp.float32) + eps)
    scale = bn_gamma.astype(jnp.float32) * inv_std                      # (C_out,)
    w_scaled = (w_t.astype(jnp.float32) * scale[:, None]).astype(x_nchw.dtype)
    shift = (bn_beta.astype(jnp.float32)
             + (conv_bias.astype(jnp.float32) - bn_mean.astype(jnp.float32)) * scale
             ).reshape(c_out, 1)

    # ---- tiling: lane axis = H*W, batch-block TB images per grid step ----
    LANE = 128
    MAX_TILE_HW = 32768                  # hard cap on lanes per step
    TARGET_STEP_BYTES = 2 << 20          # ~2 MiB in+out HBM traffic per step

    c_in_pad = _round_up(c_in, _sublane_multiple(x_nchw.dtype))
    c_out_pad = _round_up(c_out, _sublane_multiple(out_dtype))
    per_lane_bytes = c_in_pad * in_item + c_out_pad * out_item

    if hw >= LANE:
        budget_lanes = max(LANE, (TARGET_STEP_BYTES // per_lane_bytes) // LANE * LANE)
        tile_hw = min((hw // LANE) * LANE, MAX_TILE_HW, budget_lanes)
    else:
        tile_hw = hw                     # block == full array dim (legal)
    n_hw = pl.cdiv(hw, tile_hw)          # ragged last block -> Pallas masked store

    per_image_step_bytes = per_lane_bytes * tile_hw
    tb = int(max(1, min(n, TARGET_STEP_BYTES // per_image_step_bytes)))
    if n_hw == 1 and n > 1:
        tb = min(tb, max(1, n // 2))     # keep >=2 grid steps for v7x's 2 TCs
    while n % tb != 0:                   # exact batch blocking (no ragged lead dim)
        tb -= 1
    grid = (n // tb, n_hw)

    cost = pl.CostEstimate(
        flops=2 * n * hw * c_in * c_out,
        transcendentals=0,
        bytes_accessed=n * hw * (c_in * in_item + c_out * out_item)
        + (c_out * c_in + c_out) * 4,
    )

    out3 = pl.pallas_call(
        _deconv_bn_relu_kernel,
        out_shape=jax.ShapeDtypeStruct((n, c_out, hw), out_dtype),
        grid_spec=pltpu.PrefetchScalarGridSpec(
            num_scalar_prefetch=0,
            grid=grid,
            in_specs=[
                # x tile: (TB, C_in, tile_hw), lane-dense
                pl.BlockSpec((tb, c_in, tile_hw), lambda b, j: (b, 0, j)),
                # resident scaled weight / shift (tiny, same block every step)
                pl.BlockSpec((c_out, c_in), lambda b, j: (0, 0)),
                pl.BlockSpec((c_out, 1), lambda b, j: (0, 0)),
            ],
            out_specs=pl.BlockSpec((tb, c_out, tile_hw), lambda b, j: (b, 0, j)),
        ),
        compiler_params=pltpu.CompilerParams(
            # Per-step buffers stay well under the default scoped VMEM limit on
            # v5e/v6e/v7x (<= ~6 MiB double-buffered), so no vmem override.
            dimension_semantics=("parallel", "parallel"),
        ),
        cost_estimate=cost,
    )(x3, w_scaled, shift)

    return out3.reshape(n, c_out, h, w)


def _reference(x, weight, conv_bias, bn_gamma, bn_beta, bn_mean, bn_var, eps):
    n, c_in, h, w = x.shape
    c_out = weight.shape[1]
    xf = jnp.transpose(x, (0, 2, 3, 1)).reshape(-1, c_in)
    y = xf @ weight.reshape(c_in, c_out) + conv_bias
    y = (y - bn_mean) / jnp.sqrt(bn_var + eps) * bn_gamma + bn_beta
    y = jnp.maximum(y, 0.0)
    return y.reshape(n, h, w, c_out).transpose(0, 3, 1, 2)


if __name__ == "__main__":
    eps = 1e-5
    key = jax.random.PRNGKey(0)

    # (N, C_in, C_out, H, W): main case, batched-TB case, ragged-H*W case
    configs = [(2, 4, 8, 16, 16), (8, 4, 8, 8, 8), (2, 4, 8, 17, 17)]

    for (N, C_IN, C_OUT, H, W) in configs:
        key, kx, kw, kb, kg, kbe, km, kv = jax.random.split(key, 8)
        x = jax.random.normal(kx, (N, C_IN, H, W), dtype=jnp.float32)
        # ConvTranspose2d weight layout: (in_channels, out_channels, kH, kW)
        weight = jax.random.normal(kw, (C_IN, C_OUT, 1, 1), dtype=jnp.float32) * 0.1
        conv_bias = jax.random.normal(kb, (C_OUT,), dtype=jnp.float32) * 0.1
        bn_gamma = 1.0 + 0.1 * jax.random.normal(kg, (C_OUT,), dtype=jnp.float32)
        bn_beta = 0.1 * jax.random.normal(kbe, (C_OUT,), dtype=jnp.float32)
        bn_mean = 0.1 * jax.random.normal(km, (C_OUT,), dtype=jnp.float32)
        bn_var = 0.5 + jnp.abs(jax.random.normal(kv, (C_OUT,), dtype=jnp.float32))

        out = deconv2d_block_forward(x, weight, conv_bias, bn_gamma, bn_beta,
                                     bn_mean, bn_var, eps=eps)
        out = jax.block_until_ready(out)
        ref = _reference(x, weight, conv_bias, bn_gamma, bn_beta, bn_mean,
                         bn_var, eps)

        assert out.shape == (N, C_OUT, H, W)
        assert jnp.allclose(out, ref, atol=1e-4, rtol=1e-4), \
            f"mismatch vs reference for config {(N, C_IN, C_OUT, H, W)}"

    print("KERNEL_OK")
</pallas_src>

<mosaic_0001>
module attributes {stable_mosaic.version = 11 : i64} {
  func.func @_deconv_bn_relu_kernel(%arg0: i32, %arg1: i32, %arg2: memref<1x4x256xf32, #tpu.memory_space<vmem>>, %arg3: memref<8x4xf32, #tpu.memory_space<vmem>>, %arg4: memref<8x1xf32, #tpu.memory_space<vmem>>, %arg5: memref<1x8x256xf32, #tpu.memory_space<vmem>>) attributes {dimension_semantics = [#tpu.dimension_semantics<parallel>, #tpu.dimension_semantics<parallel>], iteration_bounds = array<i64: 2, 1>, scalar_prefetch = 0 : i64, scratch_operands = 0 : i64, tpu.core_type = #tpu.core_type<tc>, window_params = [{transform_indices = @transform_0, window_bounds = array<i64: 1, 4, 256>}, {pipeline_mode = #tpu.pipeline_mode<synchronous>, transform_indices = @transform_1, window_bounds = array<i64: 8, 4>}, {pipeline_mode = #tpu.pipeline_mode<synchronous>, transform_indices = @transform_2, window_bounds = array<i64: 8, 1>}, {transform_indices = @transform_3, window_bounds = array<i64: 1, 8, 256>}]} {
    %c0 = arith.constant 0 : index
    %c0_0 = arith.constant 0 : index
    %c0_1 = arith.constant 0 : index
    %0 = vector.load %arg2[%c0, %c0_0, %c0_1] : memref<1x4x256xf32, #tpu.memory_space<vmem>>, vector<1x4x256xf32>
    %c0_2 = arith.constant 0 : index
    %c0_3 = arith.constant 0 : index
    %1 = vector.load %arg3[%c0_2, %c0_3] : memref<8x4xf32, #tpu.memory_space<vmem>>, vector<8x4xf32>
    %2 = vector.shape_cast %1 : vector<8x4xf32> to vector<1x8x4xf32>
    %cst = arith.constant dense<0.000000e+00> : vector<1x8x256xf32>
    %3 = tpu.matmul %2, %0, %cst {dimension_numbers = #tpu.dot_dimension_numbers<[2], [1], [1], [2], [0, 0, 0, 1, 1, 2], [0], [0]>} : vector<1x8x4xf32>, vector<1x4x256xf32>, vector<1x8x256xf32> -> vector<1x8x256xf32>
    %c0_4 = arith.constant 0 : index
    %c0_5 = arith.constant 0 : index
    %4 = vector.load %arg4[%c0_4, %c0_5] : memref<8x1xf32, #tpu.memory_space<vmem>>, vector<8x1xf32>
    %5 = vector.shape_cast %4 : vector<8x1xf32> to vector<1x8x1xf32>
    %6 = vector.broadcast %5 : vector<1x8x1xf32> to vector<1x8x256xf32>
    %7 = arith.addf %3, %6 : vector<1x8x256xf32>
    %cst_6 = arith.constant 0.000000e+00 : f32
    %8 = vector.broadcast %cst_6 : f32 to vector<1x8x256xf32>
    %9 = arith.maximumf %7, %8 : vector<1x8x256xf32>
    %c0_7 = arith.constant 0 : index
    %c0_8 = arith.constant 0 : index
    %c0_9 = arith.constant 0 : index
    %10 = vector.load %arg5[%c0_7, %c0_8, %c0_9] : memref<1x8x256xf32, #tpu.memory_space<vmem>>, vector<1x8x256xf32>
    tpu.vector_store %arg5[%c0_7, %c0_8, %c0_9], %9 {strides = array<i32>} : memref<1x8x256xf32, #tpu.memory_space<vmem>>, vector<1x8x256xf32>,
    return
  }
  func.func @transform_0(%arg0: i32, %arg1: i32) -> (i32, i32, i32) {
    %c0_i32 = arith.constant 0 : i32
    %c0_i32_0 = arith.constant 0 : i32
    return %arg0, %c0_i32, %arg1 : i32, i32, i32
  }
  func.func @transform_1(%arg0: i32, %arg1: i32) -> (i32, i32) {
    %c0_i32 = arith.constant 0 : i32
    %c0_i32_0 = arith.constant 0 : i32
    %c0_i32_1 = arith.constant 0 : i32
    return %c0_i32, %c0_i32_0 : i32, i32
  }
  func.func @transform_2(%arg0: i32, %arg1: i32) -> (i32, i32) {
    %c0_i32 = arith.constant 0 : i32
    %c0_i32_0 = arith.constant 0 : i32
    %c0_i32_1 = arith.constant 0 : i32
    return %c0_i32, %c0_i32_0 : i32, i32
  }
  func.func @transform_3(%arg0: i32, %arg1: i32) -> (i32, i32, i32) {
    %c0_i32 = arith.constant 0 : i32
    %c0_i32_0 = arith.constant 0 : i32
    return %arg0, %c0_i32, %arg1 : i32, i32, i32
  }
}

</mosaic_0001>

<bundles_post_ra>
// kernel: tpu_custom_call.1
= control target key start
LH: loop header
LB: loop body
LE: loop exit
PB: predicated region body
PF: predicated region fallthrough
CT: control target
= control target key end

     0   :  { %8 = vsyncpa [#allocation3], 0  ;;  %s685_s0 = inlined_call_operand.vmem [shape: f32[2,4,256], index: 0, kind: input, shape index: {}]   ;;  %s686_s1 = inlined_call_operand.vmem [shape: f32[8,4], index: 1, kind: input, shape index: {}]   ;;  %s687_s2 = inlined_call_operand.vmem [shape: f32[8,1], index: 2, kind: input, shape index: {}]   ;;  %s688_s3 = inlined_call_operand.hbm [shape: f32[2,8,256], index: 3, kind: output, shape index: {}]  }
   0x1   :  { %10 = vsyncpa [#allocation3 + $0x1], 0  ;;  %s567_s12 = smov 0   ;;  %s569_s13 = smov 0  }
   0x2   :  { %s571_s14 = smov 0   ;;  %s573_s15 = smov 0  }
   0x3   :  { %s575_s16 = smov 0   ;;  %s577_s17 = smov 0  }
   0x4 LB: > { %s387_s18 = sadd.s32 4294967295, %s542_s17   ;;  %s388_s19 = sadd.s32 4294967294, %s542_s17   ;;  %s542_s17 = sphi %s577_s17, %s16_s17   ;;  %s538_s16 = sphi %s575_s16, %s695_s16   ;;  %s534_s15 = sphi %s573_s15, %s694_s15   ;;  %s530_s14 = sphi %s571_s14, %s693_s14   ;;  %s526_s13 = sphi %s569_s13, %s692_s13   ;;  %s522_s12 = sphi %s567_s12, %s691_s12  }
   0x5   : > { %s28_s20 = sadd.s32 1, %s538_s16  ;;  %s107_s21 = sadd.s32 1, %s530_s14 }
   0x6   : > { %p30_p0 = scmp.ge.s32.totalorder %s28_s20, 2  ;;  %p117_p1 = scmp.ne.s32.totalorder %s530_s14, %s526_s13 }
   0x7   : > { %p118_p2 = scmp.eq.s32.totalorder %s387_s18, 1  ;;  %p123_p3 = scmp.ne.s32.totalorder %s526_s13, %s522_s12 }
   0x8   : > { %s697_s20 = smov (%p30_p0, %s28_s20), 0  ;;  %p124_p5 = scmp.eq.s32.totalorder %s388_s19, 1 }
   0x9   : > { %p607_p4 = por %p118_p2, %p117_p1  ;;  %s102_s23 = ssub.s32 %s538_s16, %s697_s20 }
   0xa   : > { %p391_p6 = scmp.ge.s32.totalorder %s542_s17, 1  ;;  %p105_p7 = scmp.eq.s32.totalorder %s102_s23, 0 }
   0xb   : > { %p614_p8 = por %p124_p5, %p123_p3  ;;  %p161_p9 = scmp.lt.s32.totalorder %s542_s17, 3 }
   0xc   : > { %s620_s25 = scalar_select %p105_p7, %s530_s14, %s107_s21  }
   0xd   : > { %p162_p10 = pnand %p391_p6, %p161_p9 }
   0xe   : > { %p190_p11 = scmp.lt.s32.totalorder (!%p162_p10), %s534_s15, 1  ;;  %v544_v0 = vmov (!%p162_p10), 0.0   ;;  %v545_v1 = vmov (!%p162_p10), 0   ;;  %v202_v2 = vld [vmem:[%s687_s2] sm:$0xff] (!%p162_p10)  ;;  %vm214_vm0 = vcmask (!%p162_p10), 1043456   ;;  %vm210_vm1 = vcmask (!%p162_p10), 31744  }
   0xf   : > { %165 = sbr.rel (%p162_p10) target bundleno = 262 (0x106), region = 32  ;;  %283 = vmatprep.mubr.f32.mxu0 (!%p162_p10), %v544_v0  ;;  %462 = vset.pattern.permute.xlu0 (!%p162_p10), %v545_v1  ;;  %v201_v5 = vld [vmem:[%s686_s1] sm:$0xff] (!%p162_p10)  ;;  %s186_s8 = sand.u32 (!%p162_p10), 1, %s526_s13  }
  0x10   : > { %205 = vperm.xlu0 (!%p162_p10), %462, %v202_v2   ;;  %s392_s9 = sshll.u32 (!%p162_p10), %s186_s8, 4  ;;  %s404_s10 = sshll.u32 (!%p162_p10), %s534_s15, 8 }
  0x11   : > { %s188_s11 = scalar_lea.vmem (!%p162_p10), [#allocation2], %s392_s9  ;;  %s638_s23 = scalar_lea.hbm (!%p162_p10), %s688_s3, %s404_s10 }
  0x12   : > { %s311_s18 = sshll.u32 (!%p162_p10), %s188_s11, 4  ;;  %s295_s26 = scalar_lea.sflag (!%p162_p10), [#allocation3], %s186_s8  ;;  %s640_s18 = int_to_ptr.vmem [resolvable:$true] %s311_s18 }
  0x13   : > { %s464_s27 = scalar_lea.vmem (!%p162_p10), %s640_s18, 256 }
  0x14   : > { %p465_p12 = scmp.ne.s32.totalorder (!%p162_p10), %s640_s18, %s464_s27 }
  0x16   : > { %s191_s28 = scalar_select %p190_p11, %s534_s15, 1 }
  0x17   : > { %p466_p13 = pnand %p465_p12, %p607_p4  ;;  %s546_s15 = smov [#allocation2]  }
  0x18   : > { %s403_s29 = sshll.u32 %s191_s28, 3  ;;  %s468_s28 = sshll.u32 %s546_s15, 4  ;;  %s469_s28 = int_to_ptr.vmem [resolvable:$false] %s468_s28 }
  0x19   : > { %s197_s5 = scalar_lea.vmem %s685_s0, %s403_s29  ;;  %p467_p0 = pneg %p466_p13 }
  0x1a   : > { %v200_v3 = vld [vmem:[%s197_s5] sm:$0xff]  ;;  %s470_s29 = scalar_lea.vmem %s469_s28, 512  ;;  %p471_p1 = scmp.lt.s32.totalorder %s640_s18, %s469_s28 }
  0x1b   : > { %v209_v4 = vcombine.high %v200_v3, %v200_v3  ;;  %p472_p2 = scmp.lt.s32.totalorder %s470_s29, %s464_s27 }
  0x1d   : > { %395 = vmatprep.subr.msk.mxu0 %vm214_vm0, %v209_v4  ;;  %p473_p3 = por %p472_p2, %p471_p1 }
  0x1e   : > { %396 = vmatpush1.msk.msra.mxu0 %vm214_vm0, %v200_v3 }
  0x1f   : > { %397 = vmatmul.mubr.msk.f32.vlgmr.msra.gmra.mrb[0].mxu0 %vm210_vm1, %v201_v5  ;;  %p474_p5 = pnand %p473_p3, %p467_p0 }
  0x8f   : > { %v206_v6 = vpop.permute.xlu0 %205 }
  0xf2   : > { %v285_v7 = vpop.f32.mrb[0].mxu0 }
  0xf3   : > { %v286_v8 = vadd.f32 %v285_v7, %v206_v6  ;;  %v287_v9 = vpop.f32.mrb[1].mxu0 }
  0xf4   : > { %v288_v10 = vadd.f32 %v287_v9, %v206_v6 }
  0xf5   : > { %v290_v11 = vmax.f32 %v286_v8, 0.0 }
  0xf6   : > { %v291_v12 = vmax.f32 %v288_v10, 0.0 }
  0xf7   : > { %292 = vst [vmem:[%s188_s11] sm:$0xff] %v290_v11 }
  0xf8   : > { %293 = vst [vmem:[%s188_s11 + $0x8] sm:$0xff] %v291_v12 }
  0xf9   : > { %477 = shalt.err (!%p474_p5)
}
  0xfa   : > { %s478_s30 = scalar_lea.hbm %s638_s23, 256  ;;  %s482_s6 = scalar_lea.hbm %s688_s3, 512 }
  0xfb   : > { %p479_p6 = scmp.ne.s32.totalorder %s638_s23, %s478_s30  ;;  %p483_p10 = scmp.lt.u32.totalorder %s638_s23, %s688_s3 }
  0xfc   : > { %p484_p11 = scmp.lt.u32.totalorder %s482_s6, %s478_s30  ;;  %p486_p13 = scmp.lt.u32.totalorder %s478_s30, %s638_s23 }
  0xfd   : > { %p480_p7 = pnand %p479_p6, %p607_p4 }
  0xfe   : > { %p485_p12 = por %p484_p11, %p483_p10 }
  0xff   : > { %p481_p9 = pneg %p480_p7 }
 0x100   : > { %p487_p0 = por %p486_p13, %p485_p12 }
 0x102   : > { %p488_p1 = pnand %p487_p0, %p481_p9 }
 0x104   : > { %491 = shalt.err (!%p488_p1)
}
 0x105   : > { %405 = dma.vmem_to_hbm [thread:$0]  (%p607_p4), %s640_s18, 256, %s638_s23, %s295_s26  }
 0x106 PF: > { %p411_p2 = scmp.ge.s32.totalorder %s542_s17, 2  ;;  %s323_s9 = sand.u32 1, %s522_s12  }
 0x107   : > { %s324_s10 = scalar_lea.sflag [#allocation3], %s323_s9 }
 0x108   : > { %p408_p3 = pnand %p411_p2, %p614_p8 }
 0x10a   : > { %517 = dma.done.wait (!%p408_p3), %s324_s10, 256  }
 0x10b   : > { %519 = vsyncadd (!%p408_p3), %s324_s10, 4294967040  ;;  %s16_s17 = sadd.s32 1, %s542_s17   ;;  %s691_s12 = smov %s526_s13 }
 0x10c   : > { %p13_p5 = scmp.ge.s32.totalorder %s16_s17, 4   ;;  %s692_s13 = smov %s530_s14 }
 0x10d   : > { %s693_s14 = smov %s620_s25  ;;  %s694_s15 = smov %s538_s16 }
 0x10e   : > { %s695_s16 = smov %s697_s20  ;;  %15 = sbr.rel (!%p13_p5) target bundleno = 4 (0x4), region = 67 }
 0x115   :  { %329 = vsyncpa [#allocation3], 1 }
 0x116   :  { %331 = vsyncpa [#allocation3 + $0x1], 1 }

</bundles_post_ra>
